<compile_context>
chip_gen: v5e
topology: v5e:2x2
jax: 0.10.0
libtpu: 0.0.40
codegen_flags: <defaults>
</compile_context>

<pallas_src>
import functools

import jax
import jax.numpy as jnp
from jax.experimental import pallas as pl
from jax.experimental.pallas import tpu as pltpu

LANE = 128
SUBLANE = 8
_BUDGET_FRACTION = 0.70    # pipeline-buffer working-set target
_LIMIT_FRACTION = 0.875    # explicit scoped-VMEM request (headroom for Mosaic scratch)


def _round_up(x, m):
    return (x + m - 1) // m * m


# --------------------------------------------------------------------------- #
# Hardware queries (trace-time, defensive)                                     #
# --------------------------------------------------------------------------- #
def _vmem_capacity_bytes():
    try:
        cap = getattr(pltpu.get_tpu_info(), "vmem_capacity_bytes", None)
        if cap:
            return int(cap)
    except Exception:
        pass
    try:
        kind = jax.devices()[0].device_kind.lower()
    except Exception:
        kind = ""
    if "v2" in kind or "v3" in kind:
        return 16 * 1024 * 1024
    if any(t in kind for t in ("v4", "v5", "v6")):
        return 128 * 1024 * 1024
    return 64 * 1024 * 1024            # v7x and unknown parts: conservative


def _has_bf16_vpu():
    # v6e/v7x have bf16 VPU/EUP datapaths; v5e and older do not.
    try:
        kind = jax.devices()[0].device_kind.lower()
    except Exception:
        return False
    return not any(t in kind for t in ("v2", "v3", "v4", "v5"))


# --------------------------------------------------------------------------- #
# Kernel                                                                       #
# --------------------------------------------------------------------------- #
def _swiglu_epilogue(gate, val, bg_ref, bv_ref, o_ref, approx_sigmoid, bf16_epilogue):
    gate = gate + bg_ref[...]
    val = val + bv_ref[...]
    if bf16_epilogue:
        # v6e/v7x: bf16 VPU/EUP halves vreg pressure of the elementwise tail.
        gate = gate.astype(jnp.bfloat16)
        val = val.astype(jnp.bfloat16)
    one = jnp.asarray(1.0, dtype=gate.dtype)
    denom = one + jnp.exp(-gate)                       # exp lives on the EUP
    if approx_sigmoid:
        sig = pl.reciprocal(denom, approx=True)        # EUP vrcp: free vs VALU divide
    else:
        sig = one / denom                              # exact path (testing / strict users)
    o_ref[...] = (gate * sig * val).astype(o_ref.dtype)


def _swiglu_kernel(x_ref, wg_ref, wv_ref, bg_ref, bv_ref, o_ref, *acc_refs,
                   k_tiled, approx_sigmoid, bf16_epilogue):
    # Matmul operands in the weight dtype (bf16 weights -> bf16 MXU, even if the
    # activation block arrived as f32); accumulation always in f32.
    x = x_ref[...].astype(wg_ref.dtype)
    gate = jnp.dot(x, wg_ref[...], preferred_element_type=jnp.float32)
    val = jnp.dot(x, wv_ref[...], preferred_element_type=jnp.float32)

    if k_tiled:
        acc_g, acc_v = acc_refs
        k = pl.program_id(2)

        @pl.when(k == 0)
        def _():
            acc_g[...] = jnp.zeros_like(acc_g)
            acc_v[...] = jnp.zeros_like(acc_v)

        acc_g[...] += gate
        acc_v[...] += val

        @pl.when(k == pl.num_programs(2) - 1)
        def _():
            _swiglu_epilogue(acc_g[...], acc_v[...], bg_ref, bv_ref, o_ref,
                             approx_sigmoid, bf16_epilogue)
    else:
        _swiglu_epilogue(gate, val, bg_ref, bv_ref, o_ref,
                         approx_sigmoid, bf16_epilogue)


# --------------------------------------------------------------------------- #
# Parameter prep (one-time; cache the result, do NOT call per forward)         #
# --------------------------------------------------------------------------- #
def prepare_swiglu_params(weight, bias, dim_out, *, param_dtype=None):
    """weight: [2*dim_out, dim_in] (nn.Linear layout); bias: [2*dim_out].
    Returns (wg, wv, bg, bv): weights transposed to [dim_in, dim_out_p] with
    dim_out_p = round_up(dim_out, 128) zero-padded; biases as f32 [1, dim_out_p].
    """
    # TODO(synk): optional fp8 weight path (per-tile scales folded into the f32
    # epilogue) for v7x inference; bf16 is the portable fast path here.
    dim_out_p = _round_up(dim_out, LANE)
    pad_n = dim_out_p - dim_out
    wg = weight[:dim_out, :].T
    wv = weight[dim_out:, :].T
    bg = bias[:dim_out].reshape(1, dim_out).astype(jnp.float32)
    bv = bias[dim_out:].reshape(1, dim_out).astype(jnp.float32)
    if pad_n:
        wg = jnp.pad(wg, ((0, 0), (0, pad_n)))
        wv = jnp.pad(wv, ((0, 0), (0, pad_n)))
        bg = jnp.pad(bg, ((0, 0), (0, pad_n)))
        bv = jnp.pad(bv, ((0, 0), (0, pad_n)))
    if param_dtype is not None:
        wg = wg.astype(param_dtype)   # matmul operands (e.g. bf16 for MXU peak)
        wv = wv.astype(param_dtype)   # biases stay f32: added after f32 accumulation
    return wg, wv, bg, bv


# --------------------------------------------------------------------------- #
# Tiling / VMEM model                                                          #
# --------------------------------------------------------------------------- #
def _footprint(tm, tn, tk, *, x_bytes, w_bytes, o_bytes, nbuf_x, nbuf_w, k_tiled):
    f = (nbuf_x * tm * tk * x_bytes           # x tiles
         + nbuf_w * 2 * tk * tn * w_bytes     # wg + wv tiles
         + 2 * tm * tn * o_bytes              # out tiles (double-buffered)
         + 2 * 2 * SUBLANE * tn * 4           # f32 bias tiles (sublane-padded)
         + 3 * tm * tn * 4                    # in-kernel f32 gate/val/epilogue temps
         + tm * tk * w_bytes)                 # in-kernel x cast copy (worst case)
    if k_tiled:
        f += 2 * tm * tn * 4                  # f32 accumulator scratch (gate + val)
    return f


def _pick_tiles(M, dim_in, dim_out_p, x_bytes, w_bytes, o_bytes,
                block_m, block_n, block_k, budget, single_buffer):
    m_align = SUBLANE * max(1, 4 // min(x_bytes, o_bytes))
    M_cap = _round_up(M, m_align)

    # N-tile candidates: multiples of 128 that divide the padded dim_out.
    tn_cap = dim_out_p if block_n is None else min(
        dim_out_p, max(LANE, _round_up(block_n, LANE)))
    tn_divs = [d for d in range(LANE, dim_out_p + 1, LANE)
               if dim_out_p % d == 0 and d <= tn_cap] or [LANE]

    # K-tile candidates: full dim_in first; for very large dim_in, descending
    # 128-multiples that exactly divide dim_in (K-reduction must not see padding).
    if (block_k is not None and dim_in % block_k == 0
            and (block_k == dim_in or block_k % LANE == 0)):
        tk_opts = [block_k]
    else:
        tk_opts = [dim_in]
        if dim_in >= 2048:
            tk_opts += sorted(
                (d for d in range(512, dim_in, LANE) if dim_in % d == 0),
                reverse=True)

    # M-tile candidates.
    if block_m is not None:
        tm_opts = [min(_round_up(block_m, m_align), M_cap)]
    else:
        tm_opts = [t for t in (512, 256) if t <= M_cap] or [M_cap]

    nbuf_w_full = 1 if single_buffer else 2   # weights single-buffered on the no-K path

    def fits(tm, tn, tk):
        k_tiled = tk != dim_in
        return _footprint(tm, tn, tk, x_bytes=x_bytes, w_bytes=w_bytes,
                          o_bytes=o_bytes, nbuf_x=2,
                          nbuf_w=2 if k_tiled else nbuf_w_full,
                          k_tiled=k_tiled) <= budget

    def best_tn(tm, tk, tn_floor):
        cand = [d for d in tn_divs if d >= tn_floor and fits(tm, d, tk)]
        return max(cand) if cand else None

    big_floor = min(256, dim_out_p)   # feed the 256x256 MXU (v6e/v7x) when we can
    # 1) no K split (or the requested one), tn >= 256 where possible.
    for tm in tm_opts:
        tn = best_tn(tm, tk_opts[0], big_floor)
        if tn is not None:
            return tm, tn, tk_opts[0]
    # 2) K tiling (large dim_in on small-VMEM parts), still tn >= 256.
    for tk in tk_opts[1:]:
        for tm in tm_opts:
            tn = best_tn(tm, tk, big_floor)
            if tn is not None:
                return tm, tn, tk
    # 3) allow tn = 128 before shrinking tm below 256.
    for tk in tk_opts:
        for tm in tm_opts:
            tn = best_tn(tm, tk, LANE)
            if tn is not None:
                return tm, tn, tk
    # 4) last resort: shrink tm.
    tm = tm_opts[-1]
    while tm > m_align:
        tm = max(m_align, _round_up(tm // 2, m_align))
        for tk in tk_opts:
            tn = best_tn(tm, tk, LANE)
            if tn is not None:
                return tm, tn, tk
    return m_align, LANE, tk_opts[-1]


def _maybe_single_buffered_spec(shape, index_map, single_buffer):
    """BlockSpec with pipeline_mode=pl.Buffered(1) for blocks invariant along the
    inner grid axis (one resident copy instead of a double buffer frees VMEM for
    larger tiles).  Falls back to a plain BlockSpec if this jax rejects it."""
    if single_buffer:
        try:
            return pl.BlockSpec(shape, index_map, pipeline_mode=pl.Buffered(1))
        except Exception:
            try:
                return pl.BlockSpec(shape, index_map,
                                    pipeline_mode=pl.Buffered(buffer_count=1))
            except Exception:
                pass
    return pl.BlockSpec(shape, index_map)


# --------------------------------------------------------------------------- #
# Wrapper                                                                      #
# --------------------------------------------------------------------------- #
@functools.partial(
    jax.jit,
    static_argnames=("dim_out", "block_m", "block_n", "block_k",
                     "compute_dtype", "single_buffer", "approx_sigmoid"))
def swiglu_pallas(x, wg, wv, bg, bv, *, dim_out, block_m=None, block_n=None,
                  block_k=None, compute_dtype=None, single_buffer=True,
                  approx_sigmoid=True):
    """x: [..., dim_in]; (wg, wv, bg, bv) from prepare_swiglu_params."""
    orig_shape = x.shape
    dim_in = orig_shape[-1]
    out_dtype = x.dtype

    if compute_dtype is not None:
        wg = wg.astype(compute_dtype)   # usually a no-op (params prepared in this dtype)
        wv = wv.astype(compute_dtype)

    x2d = x.reshape(-1, dim_in)
    M = x2d.shape[0]
    dim_out_p = wg.shape[1]

    cap = _vmem_capacity_bytes()
    budget = int(cap * _BUDGET_FRACTION)
    vmem_limit = int(cap * _LIMIT_FRACTION)

    w_bytes = wg.dtype.itemsize
    o_bytes = jnp.dtype(out_dtype).itemsize
    tm, tn, tk = _pick_tiles(M, dim_in, dim_out_p,
                             x2d.dtype.itemsize, w_bytes, o_bytes,
                             block_m, block_n, block_k, budget, single_buffer)
    k_tiled = tk != dim_in
    gm = pl.cdiv(M, tm)
    gn = dim_out_p // tn
    gk = dim_in // tk

    # Grid ordering (2-D case only; K-tiled path is N-outer/M/K-inner):
    # N-outer re-reads x gn times (weights read once); M-outer re-reads the
    # weights gm times (x read once).  Pick the cheaper HBM traffic if it fits.
    w_total = 2 * dim_in * dim_out_p * w_bytes
    x_total = M * dim_in * x2d.dtype.itemsize
    n_outer = True
    if not k_tiled and gn > 1:
        fits_m_outer = _footprint(
            tm, tn, tk, x_bytes=x2d.dtype.itemsize, w_bytes=w_bytes,
            o_bytes=o_bytes, nbuf_x=1 if single_buffer else 2, nbuf_w=2,
            k_tiled=False) <= budget
        if fits_m_outer and (x_total + gm * w_total) < (w_total + gn * x_total):
            n_outer = False

    # Only pre-cast x in the wrapper when it pays: gn > 1 on the N-outer path
    # means x is re-read gn times from HBM, amortizing the extra cast pass.
    # Otherwise the per-block cast happens inside the kernel (no extra HBM pass).
    if n_outer and gn > 1 and w_bytes < x2d.dtype.itemsize:
        x2d = x2d.astype(wg.dtype)

    bf16_epi = (jnp.dtype(out_dtype) == jnp.bfloat16) and _has_bf16_vpu()
    kernel = functools.partial(_swiglu_kernel, k_tiled=k_tiled,
                               approx_sigmoid=approx_sigmoid,
                               bf16_epilogue=bf16_epi)

    w_shape, b_shape, o_blk = (tk, tn), (1, tn), (tm, tn)
    if k_tiled:
        grid = (gn, gm, gk)
        in_specs = [
            pl.BlockSpec((tm, tk), lambda j, i, k: (i, k)),
            pl.BlockSpec(w_shape, lambda j, i, k: (k, j)),
            pl.BlockSpec(w_shape, lambda j, i, k: (k, j)),
            _maybe_single_buffered_spec(b_shape, lambda j, i, k: (0, j), single_buffer),
            _maybe_single_buffered_spec(b_shape, lambda j, i, k: (0, j), single_buffer),
        ]
        out_spec = pl.BlockSpec(o_blk, lambda j, i, k: (i, j))
        dims = ("parallel", "parallel", "arbitrary")
        scratch = (pltpu.VMEM((tm, tn), jnp.float32),
                   pltpu.VMEM((tm, tn), jnp.float32))
    elif n_outer:
        grid = (gn, gm)
        in_specs = [
            pl.BlockSpec((tm, tk), lambda j, i: (i, 0)),
            _maybe_single_buffered_spec(w_shape, lambda j, i: (0, j), single_buffer),
            _maybe_single_buffered_spec(w_shape, lambda j, i: (0, j), single_buffer),
            _maybe_single_buffered_spec(b_shape, lambda j, i: (0, j), single_buffer),
            _maybe_single_buffered_spec(b_shape, lambda j, i: (0, j), single_buffer),
        ]
        out_spec = pl.BlockSpec(o_blk, lambda j, i: (i, j))
        dims = ("parallel", "parallel")
        scratch = ()
    else:   # M-outer: x block resident over the N sweep, weights streamed.
        grid = (gm, gn)
        in_specs = [
            _maybe_single_buffered_spec((tm, tk), lambda i, j: (i, 0), single_buffer),
            pl.BlockSpec(w_shape, lambda i, j: (0, j)),
            pl.BlockSpec(w_shape, lambda i, j: (0, j)),
            pl.BlockSpec(b_shape, lambda i, j: (0, j)),
            pl.BlockSpec(b_shape, lambda i, j: (0, j)),
        ]
        out_spec = pl.BlockSpec(o_blk, lambda i, j: (i, j))
        dims = ("parallel", "parallel")
        scratch = ()

    out = pl.pallas_call(
        kernel,
        # Rows are NOT padded: the grid uses cdiv and Pallas masks the ragged
        # last M block, so no jnp.pad(x) pass and no out[:M] slice are needed.
        out_shape=jax.ShapeDtypeStruct((M, dim_out_p), out_dtype),
        grid_spec=pltpu.PrefetchScalarGridSpec(
            num_scalar_prefetch=0,
            grid=grid,
            in_specs=in_specs,
            out_specs=out_spec,
            scratch_shapes=scratch),
        compiler_params=pltpu.CompilerParams(
            dimension_semantics=dims,
            vmem_limit_bytes=vmem_limit),
    )(x2d, wg, wv, bg, bv)

    if dim_out_p != dim_out:          # extra HBM pass only for non-128-multiple dim_out
        out = out[:, :dim_out]
    return out.reshape(*orig_shape[:-1], dim_out)


def swiglu_reference(x, weight, bias, dim_out):
    """Pure-JAX reference matching the PyTorch forward."""
    y = jnp.einsum("...i,oi->...o", x, weight) + bias
    return jax.nn.silu(y[..., :dim_out]) * y[..., dim_out:]


# --------------------------------------------------------------------------- #
# Demo / self-test                                                             #
# --------------------------------------------------------------------------- #
if __name__ == "__main__":
    # Deliberately non-aligned: M = 2*9 = 18 (ragged M blocks, no padding pass),
    # dim_out = 192 (lane-padded to 256), dim_in = 256 (allows a K-tiled check).
    batch, seq, dim_in, dim_out = 2, 9, 256, 192

    key = jax.random.PRNGKey(0)
    kx, kw, kb = jax.random.split(key, 3)
    x = jax.random.normal(kx, (batch, seq, dim_in), dtype=jnp.float32)
    bound = 1.0 / (dim_in ** 0.5)
    weight = jax.random.uniform(kw, (dim_out * 2, dim_in),
                                minval=-bound, maxval=bound, dtype=jnp.float32)
    bias = jax.random.uniform(kb, (dim_out * 2,),
                              minval=-bound, maxval=bound, dtype=jnp.float32)

    ref = swiglu_reference(x, weight, bias, dim_out)

    def run(x_in, params, **kw):
        # pl.Buffered(1) single-buffering is a newer pipeline feature; fall back
        # to plain double buffering if this jax/libtpu rejects it at lowering.
        try:
            return jax.block_until_ready(swiglu_pallas(x_in, *params, **kw))
        except Exception:
            return jax.block_until_ready(
                swiglu_pallas(x_in, *params, single_buffer=False, **kw))

    # 1) f32, exact sigmoid, small explicit tiles -> real (gn=2, gm=3) N-outer grid.
    params = prepare_swiglu_params(weight, bias, dim_out)
    out = run(x, params, dim_out=dim_out, block_m=8, block_n=128,
              approx_sigmoid=False)
    assert out.shape == ref.shape
    assert jnp.allclose(out, ref, atol=1e-4, rtol=1e-4), "f32 exact-path mismatch"

    # 2) bf16 weights (bf16 MXU operands, in-kernel x cast), auto tiles -> gn=1.
    params_bf16 = prepare_swiglu_params(weight, bias, dim_out,
                                        param_dtype=jnp.bfloat16)
    out_bf16 = run(x, params_bf16, dim_out=dim_out, compute_dtype=jnp.bfloat16)
    assert out_bf16.shape == ref.shape and out_bf16.dtype == x.dtype
    assert jnp.allclose(out_bf16, ref, atol=5e-2, rtol=5e-2), "bf16 mismatch"

    # 3) K-tiled path (dim_in split, f32 accumulator scratch), approx-EUP sigmoid.
    out_k = run(x, params, dim_out=dim_out, block_m=8, block_n=128, block_k=128)
    assert jnp.allclose(out_k, ref, atol=2e-2, rtol=2e-2), "K-tiled mismatch"

    # 4) M-outer ordering (gm=1, gn=2 -> x resident, weights streamed).
    out_m = run(x, params, dim_out=dim_out, block_m=32, block_n=128)
    assert jnp.allclose(out_m, ref, atol=2e-2, rtol=2e-2), "M-outer mismatch"

    print("KERNEL_OK")
</pallas_src>

<mosaic_0001>
module attributes {stable_mosaic.version = 11 : i64} {
  func.func @_swiglu_kernel(%arg0: i32, %arg1: i32, %arg2: memref<8x256xf32, #tpu.memory_space<vmem>>, %arg3: memref<256x128xf32, #tpu.memory_space<vmem>>, %arg4: memref<256x128xf32, #tpu.memory_space<vmem>>, %arg5: memref<1x128xf32, #tpu.memory_space<vmem>>, %arg6: memref<1x128xf32, #tpu.memory_space<vmem>>, %arg7: memref<8x128xf32, #tpu.memory_space<vmem>>) attributes {dimension_semantics = [#tpu.dimension_semantics<parallel>, #tpu.dimension_semantics<parallel>], iteration_bounds = array<i64: 2, 3>, scalar_prefetch = 0 : i64, scratch_operands = 0 : i64, tpu.core_type = #tpu.core_type<tc>, window_params = [{transform_indices = @transform_0, window_bounds = array<i64: 8, 256>}, {pipeline_mode = #tpu.pipeline_mode<synchronous>, transform_indices = @transform_1, window_bounds = array<i64: 256, 128>}, {pipeline_mode = #tpu.pipeline_mode<synchronous>, transform_indices = @transform_2, window_bounds = array<i64: 256, 128>}, {pipeline_mode = #tpu.pipeline_mode<synchronous>, transform_indices = @transform_3, window_bounds = array<i64: 1, 128>}, {pipeline_mode = #tpu.pipeline_mode<synchronous>, transform_indices = @transform_4, window_bounds = array<i64: 1, 128>}, {transform_indices = @transform_5, window_bounds = array<i64: 8, 128>}]} {
    %c0 = arith.constant 0 : index
    %c0_0 = arith.constant 0 : index
    %0 = vector.load %arg2[%c0, %c0_0] : memref<8x256xf32, #tpu.memory_space<vmem>>, vector<8x256xf32>
    %c0_1 = arith.constant 0 : index
    %c0_2 = arith.constant 0 : index
    %1 = vector.load %arg3[%c0_1, %c0_2] : memref<256x128xf32, #tpu.memory_space<vmem>>, vector<256x128xf32>
    %cst = arith.constant dense<0.000000e+00> : vector<8x128xf32>
    %2 = tpu.matmul %0, %1, %cst {dimension_numbers = #tpu.dot_dimension_numbers<[1], [0], [0], [1], [0, 0, 1, 1], [], []>} : vector<8x256xf32>, vector<256x128xf32>, vector<8x128xf32> -> vector<8x128xf32>
    %c0_3 = arith.constant 0 : index
    %c0_4 = arith.constant 0 : index
    %3 = vector.load %arg4[%c0_3, %c0_4] : memref<256x128xf32, #tpu.memory_space<vmem>>, vector<256x128xf32>
    %cst_5 = arith.constant dense<0.000000e+00> : vector<8x128xf32>
    %4 = tpu.matmul %0, %3, %cst_5 {dimension_numbers = #tpu.dot_dimension_numbers<[1], [0], [0], [1], [0, 0, 1, 1], [], []>} : vector<8x256xf32>, vector<256x128xf32>, vector<8x128xf32> -> vector<8x128xf32>
    %c0_6 = arith.constant 0 : index
    %c0_7 = arith.constant 0 : index
    %5 = vector.load %arg5[%c0_6, %c0_7] : memref<1x128xf32, #tpu.memory_space<vmem>>, vector<1x128xf32>
    %6 = vector.broadcast %5 : vector<1x128xf32> to vector<8x128xf32>
    %7 = arith.addf %2, %6 : vector<8x128xf32>
    %c0_8 = arith.constant 0 : index
    %c0_9 = arith.constant 0 : index
    %8 = vector.load %arg6[%c0_8, %c0_9] : memref<1x128xf32, #tpu.memory_space<vmem>>, vector<1x128xf32>
    %9 = vector.broadcast %8 : vector<1x128xf32> to vector<8x128xf32>
    %10 = arith.addf %4, %9 : vector<8x128xf32>
    %cst_10 = arith.constant 0.000000e+00 : f32
    %11 = vector.broadcast %cst_10 : f32 to vector<8x128xf32>
    %12 = arith.subf %11, %7 : vector<8x128xf32>
    %13 = math.exp %12 : vector<8x128xf32>
    %cst_11 = arith.constant 1.000000e+00 : f32
    %14 = vector.broadcast %cst_11 : f32 to vector<8x128xf32>
    %15 = arith.addf %14, %13 : vector<8x128xf32>
    %cst_12 = arith.constant 1.000000e+00 : f32
    %16 = vector.broadcast %cst_12 : f32 to vector<8x128xf32>
    %17 = arith.divf %16, %15 : vector<8x128xf32>
    %18 = arith.mulf %7, %17 : vector<8x128xf32>
    %19 = arith.mulf %18, %10 : vector<8x128xf32>
    %c0_13 = arith.constant 0 : index
    %c0_14 = arith.constant 0 : index
    %20 = vector.load %arg7[%c0_13, %c0_14] : memref<8x128xf32, #tpu.memory_space<vmem>>, vector<8x128xf32>
    tpu.vector_store %arg7[%c0_13, %c0_14], %19 {strides = array<i32>} : memref<8x128xf32, #tpu.memory_space<vmem>>, vector<8x128xf32>,
    return
  }
  func.func @transform_0(%arg0: i32, %arg1: i32) -> (i32, i32) {
    %c0_i32 = arith.constant 0 : i32
    %c0_i32_0 = arith.constant 0 : i32
    return %arg1, %c0_i32 : i32, i32
  }
  func.func @transform_1(%arg0: i32, %arg1: i32) -> (i32, i32) {
    %c0_i32 = arith.constant 0 : i32
    %c0_i32_0 = arith.constant 0 : i32
    return %c0_i32, %arg0 : i32, i32
  }
  func.func @transform_2(%arg0: i32, %arg1: i32) -> (i32, i32) {
    %c0_i32 = arith.constant 0 : i32
    %c0_i32_0 = arith.constant 0 : i32
    return %c0_i32, %arg0 : i32, i32
  }
  func.func @transform_3(%arg0: i32, %arg1: i32) -> (i32, i32) {
    %c0_i32 = arith.constant 0 : i32
    %c0_i32_0 = arith.constant 0 : i32
    return %c0_i32, %arg0 : i32, i32
  }
  func.func @transform_4(%arg0: i32, %arg1: i32) -> (i32, i32) {
    %c0_i32 = arith.constant 0 : i32
    %c0_i32_0 = arith.constant 0 : i32
    return %c0_i32, %arg0 : i32, i32
  }
  func.func @transform_5(%arg0: i32, %arg1: i32) -> (i32, i32) {
    %c0_i32 = arith.constant 0 : i32
    return %arg1, %arg0 : i32, i32
  }
}

module attributes {stable_mosaic.version = 11 : i64} {
  func.func @_swiglu_kernel(%arg0: i32, %arg1: i32, %arg2: memref<8x256xf32, #tpu.memory_space<vmem>>, %arg3: memref<256x128xf32, #tpu.memory_space<vmem>>, %arg4: memref<256x128xf32, #tpu.memory_space<vmem>>, %arg5: memref<1x128xf32, #tpu.memory_space<vmem>>, %arg6: memref<1x128xf32, #tpu.memory_space<vmem>>, %arg7: memref<8x128xf32, #tpu.memory_space<vmem>>) attributes {dimension_semantics = [#tpu.dimension_semantics<parallel>, #tpu.dimension_semantics<parallel>], iteration_bounds = array<i64: 2, 3>, scalar_prefetch = 0 : i64, scratch_operands = 0 : i64, tpu.core_type = #tpu.core_type<tc>, window_params = [{transform_indices = @transform_0, window_bounds = array<i64: 8, 256>}, {transform_indices = @transform_1, window_bounds = array<i64: 256, 128>}, {transform_indices = @transform_2, window_bounds = array<i64: 256, 128>}, {transform_indices = @transform_3, window_bounds = array<i64: 1, 128>}, {transform_indices = @transform_4, window_bounds = array<i64: 1, 128>}, {transform_indices = @transform_5, window_bounds = array<i64: 8, 128>}]} {
    %c0 = arith.constant 0 : index
    %c0_0 = arith.constant 0 : index
    %0 = vector.load %arg2[%c0, %c0_0] : memref<8x256xf32, #tpu.memory_space<vmem>>, vector<8x256xf32>
    %c0_1 = arith.constant 0 : index
    %c0_2 = arith.constant 0 : index
    %1 = vector.load %arg3[%c0_1, %c0_2] : memref<256x128xf32, #tpu.memory_space<vmem>>, vector<256x128xf32>
    %cst = arith.constant dense<0.000000e+00> : vector<8x128xf32>
    %2 = tpu.matmul %0, %1, %cst {dimension_numbers = #tpu.dot_dimension_numbers<[1], [0], [0], [1], [0, 0, 1, 1], [], []>} : vector<8x256xf32>, vector<256x128xf32>, vector<8x128xf32> -> vector<8x128xf32>
    %c0_3 = arith.constant 0 : index
    %c0_4 = arith.constant 0 : index
    %3 = vector.load %arg4[%c0_3, %c0_4] : memref<256x128xf32, #tpu.memory_space<vmem>>, vector<256x128xf32>
    %cst_5 = arith.constant dense<0.000000e+00> : vector<8x128xf32>
    %4 = tpu.matmul %0, %3, %cst_5 {dimension_numbers = #tpu.dot_dimension_numbers<[1], [0], [0], [1], [0, 0, 1, 1], [], []>} : vector<8x256xf32>, vector<256x128xf32>, vector<8x128xf32> -> vector<8x128xf32>
    %c0_6 = arith.constant 0 : index
    %c0_7 = arith.constant 0 : index
    %5 = vector.load %arg5[%c0_6, %c0_7] : memref<1x128xf32, #tpu.memory_space<vmem>>, vector<1x128xf32>
    %6 = vector.broadcast %5 : vector<1x128xf32> to vector<8x128xf32>
    %7 = arith.addf %2, %6 : vector<8x128xf32>
    %c0_8 = arith.constant 0 : index
    %c0_9 = arith.constant 0 : index
    %8 = vector.load %arg6[%c0_8, %c0_9] : memref<1x128xf32, #tpu.memory_space<vmem>>, vector<1x128xf32>
    %9 = vector.broadcast %8 : vector<1x128xf32> to vector<8x128xf32>
    %10 = arith.addf %4, %9 : vector<8x128xf32>
    %cst_10 = arith.constant 0.000000e+00 : f32
    %11 = vector.broadcast %cst_10 : f32 to vector<8x128xf32>
    %12 = arith.subf %11, %7 : vector<8x128xf32>
    %13 = math.exp %12 : vector<8x128xf32>
    %cst_11 = arith.constant 1.000000e+00 : f32
    %14 = vector.broadcast %cst_11 : f32 to vector<8x128xf32>
    %15 = arith.addf %14, %13 : vector<8x128xf32>
    %cst_12 = arith.constant 1.000000e+00 : f32
    %16 = vector.broadcast %cst_12 : f32 to vector<8x128xf32>
    %17 = arith.divf %16, %15 : vector<8x128xf32>
    %18 = arith.mulf %7, %17 : vector<8x128xf32>
    %19 = arith.mulf %18, %10 : vector<8x128xf32>
    %c0_13 = arith.constant 0 : index
    %c0_14 = arith.constant 0 : index
    %20 = vector.load %arg7[%c0_13, %c0_14] : memref<8x128xf32, #tpu.memory_space<vmem>>, vector<8x128xf32>
    tpu.vector_store %arg7[%c0_13, %c0_14], %19 {strides = array<i32>} : memref<8x128xf32, #tpu.memory_space<vmem>>, vector<8x128xf32>,
    return
  }
  func.func @transform_0(%arg0: i32, %arg1: i32) -> (i32, i32) {
    %c0_i32 = arith.constant 0 : i32
    %c0_i32_0 = arith.constant 0 : i32
    return %arg1, %c0_i32 : i32, i32
  }
  func.func @transform_1(%arg0: i32, %arg1: i32) -> (i32, i32) {
    %c0_i32 = arith.constant 0 : i32
    %c0_i32_0 = arith.constant 0 : i32
    return %c0_i32, %arg0 : i32, i32
  }
  func.func @transform_2(%arg0: i32, %arg1: i32) -> (i32, i32) {
    %c0_i32 = arith.constant 0 : i32
    %c0_i32_0 = arith.constant 0 : i32
    return %c0_i32, %arg0 : i32, i32
  }
  func.func @transform_3(%arg0: i32, %arg1: i32) -> (i32, i32) {
    %c0_i32 = arith.constant 0 : i32
    %c0_i32_0 = arith.constant 0 : i32
    return %c0_i32, %arg0 : i32, i32
  }
  func.func @transform_4(%arg0: i32, %arg1: i32) -> (i32, i32) {
    %c0_i32 = arith.constant 0 : i32
    %c0_i32_0 = arith.constant 0 : i32
    return %c0_i32, %arg0 : i32, i32
  }
  func.func @transform_5(%arg0: i32, %arg1: i32) -> (i32, i32) {
    %c0_i32 = arith.constant 0 : i32
    return %arg1, %arg0 : i32, i32
  }
}

</mosaic_0001>

<bundles_post_ra>
// kernel: swiglu_pallas.1
= control target key start
LH: loop header
LB: loop body
LE: loop exit
PB: predicated region body
PF: predicated region fallthrough
CT: control target
= control target key end

     0   :  { %s1064_s0 = inlined_call_operand.vmem [shape: f32[18,256], index: 0, kind: input, shape index: {}]   ;;  %s1065_s1 = inlined_call_operand.hbm [shape: f32[256,256], index: 1, kind: input, shape index: {}]   ;;  %s1066_s2 = inlined_call_operand.hbm [shape: f32[256,256], index: 2, kind: input, shape index: {}]   ;;  %s1067_s3 = inlined_call_operand.vmem [shape: f32[1,256], index: 3, kind: input, shape index: {}]   ;;  %s1068_s4 = inlined_call_operand.vmem [shape: f32[1,256], index: 4, kind: input, shape index: {}]   ;;  %s1069_s5 = inlined_call_operand.vmem [shape: f32[18,256], index: 5, kind: output, shape index: {}]  }
   0x1   :  { %1072 = sst [smem:[#allocation11_spill]] %s1065_s1 }
   0x2   :  { %10 = vsyncpa [#allocation3], 0 }
   0x3   :  { %11 = vsyncpa [#allocation5], 0  ;;  %s895_s18 = smov 0   ;;  %s897_s19 = smov 0  }
   0x4   :  { %s899_s20 = smov 0   ;;  %s901_s21 = smov 0  }
   0x5   :  { %s903_s22 = smov 0   ;;  %s905_s23 = smov 0  }
   0x6   :  { %s907_s24 = smov 0   ;;  %s909_s25 = smov 0  }
   0x7 LB: > { %1073 = sst [smem:[#allocation8_spill]] %s854_s24  ;;  %s628_s26 = sadd.s32 4294967295, %s858_s25   ;;  %s858_s25 = sphi %s909_s25, %s17_s25   ;;  %s854_s24 = sphi %s907_s24, %s1082_s24   ;;  %s850_s23 = sphi %s905_s23, %s1087_s23   ;;  %s846_s22 = sphi %s903_s22, %s1080_s22   ;;  %s842_s21 = sphi %s901_s21, %s1086_s21   ;;  %s838_s20 = sphi %s899_s20, %s1085_s20   ;;  %s834_s19 = sphi %s897_s19, %s1084_s19   ;;  %s830_s18 = sphi %s895_s18, %s1083_s18  }
   0x8   : > { %s26_s27 = sadd.s32 1, %s850_s23  ;;  %s29_s28 = sadd.s32 1, %s854_s24 }
   0x9   : > { %p27_p0 = scmp.ge.s32.totalorder %s26_s27, 3  ;;  %s62_s29 = sadd.s32 1, %s838_s20 }
   0xa   : > { %p75_p1 = scmp.ne.s32.totalorder %s834_s19, %s830_s18  ;;  %p76_p2 = scmp.eq.s32.totalorder %s628_s26, 0 }
   0xb   : > { %s1089_s27 = smov (%p27_p0, %s26_s27), 0  ;;  %s1091_s28 = smov (!%p27_p0, %s29_s28), %s854_s24 }
   0xc   : > { %1074 = sst [smem:[#allocation9_spill]] %s1089_s27  ;;  %p630_p3 = scmp.ge.s32.totalorder %s858_s25, 1 }
   0xd   : > { %p31_p4 = scmp.ge.s32.totalorder %s1091_s28, 2  ;;  %p192_p5 = scmp.lt.s32.totalorder %s858_s25, 7 }
   0xe   : > { %p943_p6 = por %p76_p2, %p75_p1  ;;  %s631_s6 = sshll.u32 %s846_s22, 3 }
   0xf   : > { %s1093_s28 = smov (%p31_p4, %s1091_s28), 0  ;;  %p950_p7 = pnand %p630_p3, %p192_p5 }
  0x10   : > { %1076 = sst [smem:[#allocation10_spill]] %s1093_s28  ;;  %s59_s11 = ssub.s32 %s854_s24, %s1093_s28 }
  0x11   : > { %s1078_s1 = sld [smem:[#allocation11_spill]]  ;;  %p60_p8 = scmp.eq.s32.totalorder %s59_s11, 0 }
  0x12   : > { %p646_p9 = pneg %p950_p7  ;;  %s860_s14 = smov [#allocation2]  }
  0x13   : > { %s962_s13 = scalar_select %p60_p8, %s838_s20, %s62_s29  }
  0x14   : > { %s207_s15 = sshll.u32 %s860_s14, 4  ;;  %p966_p10 = pnand %p646_p9, %p943_p6  ;;  %s208_s15 = int_to_ptr.vmem [resolvable:$true] %s207_s15 }
  0x15   : > { %s220_s26 = scalar_lea.hbm %s1066_s2, %s631_s6 }
  0x16   : > { %p732_p12 = pneg %p966_p10 }
  0x17   : > { %s204_s10 = scalar_lea.hbm %s1078_s1, %s631_s6  ;;  %s735_s11 = scalar_lea.hbm %s1078_s1, 512 }
  0x18   : > { %s205_s12 = sshll.u32 %s204_s10, 4  ;;  %s206_s12 = int_to_ptr.hbm [resolvable:$true] %s205_s12 }
  0x19   : > { %s728_s8 = sshra.s32 %s206_s12, 4  ;;  %s729_s8 = int_to_ptr.hbm [resolvable:$true] %s728_s8 }
  0x1a   : > { %s730_s9 = scalar_lea.hbm %s729_s8, 256  ;;  %p736_p1 = scmp.lt.s32.totalorder %s729_s8, %s1078_s1 }
  0x1b   : > { %p731_p11 = scmp.ne.s32.totalorder %s729_s8, %s730_s9  ;;  %p737_p2 = scmp.lt.s32.totalorder %s735_s11, %s730_s9 }
  0x1d   : > { %p733_p13 = pnand %p732_p12, %p731_p11  ;;  %p738_p3 = por %p737_p2, %p736_p1 }
  0x1f   : > { %p734_p0 = pneg %p733_p13 }
  0x21   : > { %p739_p4 = pnand %p738_p3, %p734_p0 }
  0x23   : > { %742 = shalt.err (!%p739_p4)
}
  0x24   : > { %s861_s6 = smov 256   ;;  %s862_s17 = smov 128  }
  0x25   : > { %s863_s18 = smov 8   ;;  %s221_s27 = sshll.u32 %s220_s26, 4  ;;  %s222_s27 = int_to_ptr.hbm [resolvable:$true] %s221_s27 }
  0x26   : > { %649 = dma.hbm_to_vmem [thread:$0]  (!%p966_p10), %s206_s12, 4096, %s208_s15, [#allocation3], %s861_s6, %s862_s17, %s863_s18  }
  0x27   : > { %s864_s24 = smov [#allocation4]   ;;  %s758_s10 = sshra.s32 %s222_s27, 4  ;;  %s759_s10 = int_to_ptr.hbm [resolvable:$true] %s758_s10 }
  0x28   : > { %s223_s29 = sshll.u32 %s864_s24, 4  ;;  %s760_s28 = scalar_lea.hbm %s759_s10, 256  ;;  %s224_s29 = int_to_ptr.vmem [resolvable:$true] %s223_s29 }
  0x29   : > { %p761_p5 = scmp.ne.s32.totalorder %s759_s10, %s760_s28  ;;  %s765_s11 = scalar_lea.hbm %s1066_s2, 512 }
  0x2a   : > { %p766_p11 = scmp.lt.s32.totalorder %s759_s10, %s1066_s2  ;;  %p767_p13 = scmp.lt.s32.totalorder %s765_s11, %s760_s28 }
  0x2b   : > { %p763_p8 = pnand %p761_p5, %p732_p12 }
  0x2c   : > { %p768_p0 = por %p767_p13, %p766_p11 }
  0x2d   : > { %p764_p9 = pneg %p763_p8 }
  0x2f   : > { %p769_p1 = pnand %p768_p0, %p764_p9 }
  0x31   : > { %772 = shalt.err (!%p769_p1)
}
  0x32   : > { %652 = dma.hbm_to_vmem [thread:$0]  (!%p966_p10), %s222_s27, 4096, %s224_s29, [#allocation5], %s861_s6, %s862_s17, %s863_s18  }
  0x33   : > { %259 = sbr.rel (%p950_p7) target bundleno = 256 (0x100), region = 40 }
  0x38   : > { %821 = dma.done.wait (%p943_p6), [#allocation3], 4096  }
  0x39   : > { %823 = vsyncadd (%p943_p6), [#allocation3], 4294963200 }
  0x3a   : > { %825 = dma.done.wait (%p943_p6), [#allocation5], 4096  }
  0x3b   : > { %827 = vsyncadd (%p943_p6), [#allocation5], 4294963200  ;;  %p302_p10 = scmp.lt.s32.totalorder %s842_s21, 2  ;;  %p307_p12 = scmp.lt.s32.totalorder %s846_s22, 1  ;;  %v338_v0 = vld [vmem:[#allocation2 + $0x78] sm:$0xff]  ;;  %v337_v1 = vld [vmem:[#allocation2 + $0x70] sm:$0xff] }
  0x3c   : > { %v354_v2 = vld [vmem:[#allocation2 + $0xf8] sm:$0xff]  ;;  %391 = vmatpush.msra.mxu0 %v338_v0  ;;  %v353_v3 = vld [vmem:[#allocation2 + $0xf0] sm:$0xff]  ;;  %v336_v4 = vld [vmem:[#allocation2 + $0x68] sm:$0xff] }
  0x3d   : > { %s1095_s21 = smov (!%p302_p10, %s842_s21), 2  ;;  %s1097_s22 = smov (!%p307_p12, %s846_s22), 1  ;;  %411 = vmatpush.msra.mxu1 %v354_v2  ;;  %v352_v5 = vld [vmem:[#allocation2 + $0xe8] sm:$0xff]  ;;  %v335_v6 = vld [vmem:[#allocation2 + $0x60] sm:$0xff]  ;;  %v334_v8 = vld [vmem:[#allocation2 + $0x58] sm:$0xff] }
  0x3e   : > { %s637_s1 = sshll.u32 %s1095_s21, 1  ;;  %392 = vmatpush.msra.mxu0 %v337_v1  ;;  %v351_v7 = vld [vmem:[#allocation2 + $0xe0] sm:$0xff]  ;;  %v350_v9 = vld [vmem:[#allocation2 + $0xd8] sm:$0xff]  ;;  %v333_v10 = vld [vmem:[#allocation2 + $0x50] sm:$0xff]  ;;  %s309_s7 = scalar_lea.vmem %s1067_s3, %s1097_s22 }
  0x3f   : > { %s1017_s24 = sadd.s32 %s637_s1, %s1097_s22  ;;  %412 = vmatpush.msra.mxu1 %v353_v3  ;;  %v349_v11 = vld [vmem:[#allocation2 + $0xd0] sm:$0xff]  ;;  %v332_v12 = vld [vmem:[#allocation2 + $0x48] sm:$0xff]  ;;  %v370_v13 = vld [vmem:[#allocation4 + $0x78] sm:$0xff]  ;;  %s641_s12 = sshll.u32 %s1095_s21, 4 }
  0x40   : > { %393 = vmatpush.msra.mxu0 %v336_v4  ;;  %v348_v14 = vld [vmem:[#allocation2 + $0xc8] sm:$0xff]  ;;  %435 = vmatpush.msra.mxu2 %v370_v13  ;;  %v369_v15 = vld [vmem:[#allocation4 + $0x70] sm:$0xff]  ;;  %v386_v16 = vld [vmem:[#allocation4 + $0xf8] sm:$0xff]  ;;  %s306_s26 = scalar_lea.vmem %s1064_s0, %s641_s12  ;;  %s312_s17 = scalar_lea.vmem %s1068_s4, %s1097_s22 }
  0x41   : > { %413 = vmatpush.msra.mxu1 %v352_v5  ;;  %v368_v17 = vld [vmem:[#allocation4 + $0x68] sm:$0xff]  ;;  %v385_v18 = vld [vmem:[#allocation4 + $0xf0] sm:$0xff]  ;;  %v331_v19 = vld [vmem:[#allocation2 + $0x40] sm:$0xff]  ;;  %455 = vmatpush.msra.mxu3 %v386_v16  ;;  %s638_s22 = sshll.u32 %s1017_s24, 3 }
  0x42   : > { %394 = vmatpush.msra.mxu0 %v335_v6  ;;  %v347_v20 = vld [vmem:[#allocation2 + $0xc0] sm:$0xff]  ;;  %436 = vmatpush.msra.mxu2 %v369_v15  ;;  %v384_v22 = vld [vmem:[#allocation4 + $0xe8] sm:$0xff]  ;;  %v330_v23 = vld [vmem:[#allocation2 + $0x38] sm:$0xff]  ;;  %s320_s8 = scalar_lea.vmem %s1069_s5, %s638_s22 }
  0x43   : > { %414 = vmatpush.msra.mxu1 %v351_v7  ;;  %v367_v21 = vld [vmem:[#allocation4 + $0x60] sm:$0xff]  ;;  %v346_v24 = vld [vmem:[#allocation2 + $0xb8] sm:$0xff]  ;;  %456 = vmatpush.msra.mxu3 %v385_v18  ;;  %v329_v27 = vld [vmem:[#allocation2 + $0x30] sm:$0xff] }
  0x44   : > { %395 = vmatpush.msra.mxu0 %v334_v8  ;;  %437 = vmatpush.msra.mxu2 %v368_v17  ;;  %v366_v25 = vld [vmem:[#allocation4 + $0x58] sm:$0xff]  ;;  %v383_v26 = vld [vmem:[#allocation4 + $0xe0] sm:$0xff]  ;;  %v345_v28 = vld [vmem:[#allocation2 + $0xb0] sm:$0xff] }
  0x45   : > { %415 = vmatpush.msra.mxu1 %v350_v9  ;;  %457 = vmatpush.msra.mxu3 %v384_v22  ;;  %v365_v29 = vld [vmem:[#allocation4 + $0x50] sm:$0xff]  ;;  %v382_v30 = vld [vmem:[#allocation4 + $0xd8] sm:$0xff]  ;;  %v328_v31 = vld [vmem:[#allocation2 + $0x28] sm:$0xff] }
  0x46   : > { %396 = vmatpush.msra.mxu0 %v333_v10  ;;  %438 = vmatpush.msra.mxu2 %v367_v21  ;;  %v344_v32 = vld [vmem:[#allocation2 + $0xa8] sm:$0xff]  ;;  %v381_v34 = vld [vmem:[#allocation4 + $0xd0] sm:$0xff]  ;;  %v327_v35 = vld [vmem:[#allocation2 + $0x20] sm:$0xff] }
  0x47   : > { %416 = vmatpush.msra.mxu1 %v349_v11  ;;  %458 = vmatpush.msra.mxu3 %v383_v26  ;;  %v364_v33 = vld [vmem:[#allocation4 + $0x48] sm:$0xff]  ;;  %v343_v36 = vld [vmem:[#allocation2 + $0xa0] sm:$0xff]  ;;  %v326_v39 = vld [vmem:[#allocation2 + $0x18] sm:$0xff] }
  0x48   : > { %397 = vmatpush.msra.mxu0 %v332_v12  ;;  %439 = vmatpush.msra.mxu2 %v366_v25  ;;  %v363_v37 = vld [vmem:[#allocation4 + $0x40] sm:$0xff]  ;;  %v380_v38 = vld [vmem:[#allocation4 + $0xc8] sm:$0xff]  ;;  %v342_v40 = vld [vmem:[#allocation2 + $0x98] sm:$0xff] }
  0x49   : > { %417 = vmatpush.msra.mxu1 %v348_v14  ;;  %459 = vmatpush.msra.mxu3 %v382_v30  ;;  %v362_v41 = vld [vmem:[#allocation4 + $0x38] sm:$0xff]  ;;  %v379_v42 = vld [vmem:[#allocation4 + $0xc0] sm:$0xff]  ;;  %v325_v43 = vld [vmem:[#allocation2 + $0x10] sm:$0xff] }
  0x4a   : > { %398 = vmatpush.msra.mxu0 %v331_v19  ;;  %440 = vmatpush.msra.mxu2 %v365_v29  ;;  %v341_v44 = vld [vmem:[#allocation2 + $0x90] sm:$0xff]  ;;  %v378_v46 = vld [vmem:[#allocation4 + $0xb8] sm:$0xff]  ;;  %v324_v47 = vld [vmem:[#allocation2 + $0x8] sm:$0xff] }
  0x4b   : > { %418 = vmatpush.msra.mxu1 %v347_v20  ;;  %460 = vmatpush.msra.mxu3 %v381_v34  ;;  %v361_v45 = vld [vmem:[#allocation4 + $0x30] sm:$0xff]  ;;  %v340_v48 = vld [vmem:[#allocation2 + $0x88] sm:$0xff]  ;;  %v323_v51 = vld [vmem:[#allocation2] sm:$0xff] }
  0x4c   : > { %399 = vmatpush.msra.mxu0 %v330_v23  ;;  %441 = vmatpush.msra.mxu2 %v364_v33  ;;  %v360_v49 = vld [vmem:[#allocation4 + $0x28] sm:$0xff]  ;;  %v377_v50 = vld [vmem:[#allocation4 + $0xb0] sm:$0xff]  ;;  %v339_v52 = vld [vmem:[#allocation2 + $0x80] sm:$0xff] }
  0x4d   : > { %419 = vmatpush.msra.mxu1 %v346_v24  ;;  %461 = vmatpush.msra.mxu3 %v380_v38  ;;  %v321_v53 = vld [vmem:[%s306_s26] sm:$0xff]  ;;  %v322_v54 = vld [vmem:[%s306_s26 + $0x8] sm:$0xff]  ;;  %v358_v57 = vld [vmem:[#allocation4 + $0x18] sm:$0xff] }
  0x4e   : > { %400 = vmatpush.msra.mxu0 %v329_v27  ;;  %442 = vmatpush.msra.mxu2 %v363_v37  ;;  %v359_v55 = vld [vmem:[#allocation4 + $0x20] sm:$0xff]  ;;  %v376_v56 = vld [vmem:[#allocation4 + $0xa8] sm:$0xff]  ;;  %v357_v59 = vld [vmem:[#allocation4 + $0x10] sm:$0xff] }
  0x4f   : > { %420 = vmatpush.msra.mxu1 %v345_v28  ;;  %462 = vmatpush.msra.mxu3 %v379_v42  ;;  %v375_v58 = vld [vmem:[#allocation4 + $0xa0] sm:$0xff]  ;;  %v374_v60 = vld [vmem:[#allocation4 + $0x98] sm:$0xff]  ;;  %v356_v61 = vld [vmem:[#allocation4 + $0x8] sm:$0xff] }
  0x50   : > { %401 = vmatpush.msra.mxu0 %v328_v31  ;;  %443 = vmatpush.msra.mxu2 %v362_v41  ;;  %v373_v62 = vld [vmem:[#allocation4 + $0x90] sm:$0xff]  ;;  %v355_v63 = vld [vmem:[#allocation4] sm:$0xff]  ;;  %v372_v0 = vld [vmem:[#allocation4 + $0x88] sm:$0xff] }
  0x51   : > { %421 = vmatpush.msra.mxu1 %v344_v32  ;;  %463 = vmatpush.msra.mxu3 %v378_v46  ;;  %v371_v1 = vld [vmem:[#allocation4 + $0x80] sm:$0xff] }
  0x52   : > { %402 = vmatpush.msra.mxu0 %v327_v35  ;;  %444 = vmatpush.msra.mxu2 %v361_v45  ;;  %v722_v2 = vld [vmem:[%s309_s7] ss:$0 sm:$0xff] }
  0x53   : > { %422 = vmatpush.msra.mxu1 %v343_v36  ;;  %464 = vmatpush.msra.mxu3 %v377_v50  ;;  %v723_v13 = vld [vmem:[%s312_s17] ss:$0 sm:$0xff] }
  0x54   : > { %403 = vmatpush.msra.mxu0 %v326_v39  ;;  %445 = vmatpush.msra.mxu2 %v360_v49 }
  0x55   : > { %423 = vmatpush.msra.mxu1 %v342_v40  ;;  %465 = vmatpush.msra.mxu3 %v376_v56 }
  0x56   : > { %404 = vmatpush.msra.mxu0 %v325_v43  ;;  %446 = vmatpush.msra.mxu2 %v359_v55 }
  0x57   : > { %424 = vmatpush.msra.mxu1 %v341_v44  ;;  %466 = vmatpush.msra.mxu3 %v375_v58 }
  0x58   : > { %405 = vmatpush.msra.mxu0 %v324_v47  ;;  %447 = vmatpush.msra.mxu2 %v358_v57 }
  0x59   : > { %425 = vmatpush.msra.mxu1 %v340_v48  ;;  %467 = vmatpush.msra.mxu3 %v374_v60 }
  0x5a   : > { %406 = vmatpush.msra.mxu0 %v323_v51  ;;  %448 = vmatpush.msra.mxu2 %v357_v59 }
  0x5b   : > { %426 = vmatpush.msra.mxu1 %v339_v52  ;;  %407 = vmatmul.f32.vlgmr.msra.gmra.mxu0 %v321_v53 }
  0x5c   : > { %427 = vmatmul.f32.vlgmr.msra.gmra.mxu1 %v322_v54  ;;  %449 = vmatpush.msra.mxu2 %v356_v61 }
  0x5d   : > { %468 = vmatpush.msra.mxu3 %v373_v62 }
  0x5e   : > { %450 = vmatpush.msra.mxu2 %v355_v63 }
  0x5f   : > { %469 = vmatpush.msra.mxu3 %v372_v0  ;;  %451 = vmatmul.f32.vlgmr.msra.gmra.mxu2 %v321_v53 }
  0x61   : > { %470 = vmatpush.msra.mxu3 %v371_v1 }
  0x62   : > { %471 = vmatmul.f32.vlgmr.msra.gmra.mxu3 %v322_v54 }
  0xd8   : > { %v408_v3 = vpop.f32.mrf.mxu0 }
  0xd9   : > { %v428_v4 = vpop.f32.mrf.mxu1  ;;  %v409_v5 = vadd.f32 %v722_v2, %v408_v3 }
  0xdb   : > { %v429_v6 = vadd.f32 %v428_v4, %v409_v5 }
  0xdd   : > { %v475_v7 = vsub.f32 0.0, %v429_v6 }
  0xdf   : > { %v476_v8 = vmul.f32 1.442695, %v475_v7 }
  0xe1   : > { %724 = vpow2.f32 %v476_v8 }
  0xe2   : > { %v452_v14 = vpop.f32.mrf.mxu2 }
  0xe3   : > { %v453_v19 = vadd.f32 %v723_v13, %v452_v14 }
  0xe5   : > { %v472_v20 = vpop.f32.mrf.mxu3 }
  0xe6   : > { %v473_v24 = vadd.f32 %v472_v20, %v453_v19 }
  0xe7   : > { %v725_v9 = vpop.eup %724 }
  0xe8   : > { %v478_v10 = vadd.f32 1.0, %v725_v9 }
  0xea   : > { %726 = vrcp.f32 %v478_v10  ;;  %v490_v16 = vand.u32 2147483648, %v478_v10  ;;  %v488_v18 = vand.u32 2147483647, %v478_v10  ;;  %vm484_vm1 = vweird.f32 %v478_v10 }
  0xec   : > { %v491_v22 = vor.u32 1.1754944e-38, %v490_v16  ;;  %vm489_vm3 = vcmp.eq.f32.partialorder %v488_v18, 8.507059e+37 }
  0xf0   : > { %v727_v11 = vpop.eup %726 }
  0xf1   : > { %v480_v12 = vmul.f32 %v727_v11, %v478_v10  ;;  %vm485_vm0 = vweird.f32 %v727_v11 }
  0xf2   : > { %vm486_vm2 = vmor %vm484_vm1, %vm485_vm0 }
  0xf3   : > { %v481_v15 = vsub.f32 1.0, %v480_v12 }
  0xf5   : > { %v482_v17 = vmul.f32 %v727_v11, %v481_v15 }
  0xf7   : > { %v483_v21 = vadd.f32 %v727_v11, %v482_v17 }
  0xf9   : > { %v487_v23 = vsel %vm486_vm2, %v727_v11, %v483_v21 }
  0xfa   : > { %v492_v25 = vsel %vm489_vm3, %v491_v22, %v487_v23 }
  0xfb   : > { %v494_v26 = vmul.f32 %v492_v25, %v429_v6 }
  0xfd   : > { %v495_v27 = vmul.f32 %v494_v26, %v473_v24 }
  0xff   : > { %496 = vst [vmem:[%s320_s8] sm:$0xff] %v495_v27 }
 0x100 PF: > { %s17_s25 = sadd.s32 1, %s858_s25   ;;  %s1080_s22 = sld [smem:[#allocation8_spill]] }
 0x101   : > { %p14_p6 = scmp.ge.s32.totalorder %s17_s25, 8   ;;  %s1081_s9 = sld [smem:[#allocation9_spill]] }
 0x102   : > { %s1082_s24 = sld [smem:[#allocation10_spill]]  ;;  %s1083_s18 = smov %s834_s19 }
 0x103   : > { %s1084_s19 = smov %s838_s20  ;;  %s1085_s20 = smov %s962_s13 }
 0x104   : > { %s1086_s21 = smov %s850_s23  ;;  %16 = sbr.rel (!%p14_p6) target bundleno = 7 (0x7), region = 87 }
 0x107   : > { %s1087_s23 = smov %s1081_s9 }
 0x109   :  { %524 = vsyncpa [#allocation3], 1 }
 0x10a   :  { %526 = vsyncpa [#allocation3 + $0x1], 1 }
 0x10b   :  { %527 = vsyncpa [#allocation5], 1 }

// kernel: swiglu_pallas.1
= control target key start
LH: loop header
LB: loop body
LE: loop exit
PB: predicated region body
PF: predicated region fallthrough
CT: control target
= control target key end

     0   :  { %s1170_s0 = inlined_call_operand.vmem [shape: f32[18,256], index: 0, kind: input, shape index: {}]   ;;  %s1171_s1 = inlined_call_operand.hbm [shape: f32[256,256], index: 1, kind: input, shape index: {}]   ;;  %s1172_s2 = inlined_call_operand.hbm [shape: f32[256,256], index: 2, kind: input, shape index: {}]   ;;  %s1173_s3 = inlined_call_operand.vmem [shape: f32[1,256], index: 3, kind: input, shape index: {}]   ;;  %s1174_s4 = inlined_call_operand.vmem [shape: f32[1,256], index: 4, kind: input, shape index: {}]   ;;  %s1175_s5 = inlined_call_operand.vmem [shape: f32[18,256], index: 5, kind: output, shape index: {}]  }
   0x1   :  { %1179 = sst [smem:[#allocation12_spill]] %s1171_s1 }
   0x2   :  { %10 = vsyncpa [#allocation3], 0 }
   0x3   :  { %12 = vsyncpa [#allocation3 + $0x1], 0 }
   0x4   :  { %13 = vsyncpa [#allocation5], 0 }
   0x5   :  { %15 = vsyncpa [#allocation5 + $0x1], 0  ;;  %s944_s18 = smov 0   ;;  %s946_s19 = smov 0  }
   0x6   :  { %s948_s20 = smov 0   ;;  %s950_s21 = smov 0  }
   0x7   :  { %s952_s22 = smov 0   ;;  %s954_s23 = smov 0  }
   0x8   :  { %s956_s24 = smov 0   ;;  %s958_s25 = smov 0  }
   0x9 LB: > { %1180 = sst [smem:[#allocation8_spill]] %s901_s23  ;;  %s676_s26 = sadd.s32 4294967295, %s909_s25   ;;  %s909_s25 = sphi %s958_s25, %s21_s25   ;;  %s905_s24 = sphi %s956_s24, %s1191_s24   ;;  %s901_s23 = sphi %s954_s23, %s1190_s23   ;;  %s897_s22 = sphi %s952_s22, %s1189_s22   ;;  %s893_s21 = sphi %s950_s21, %s1188_s21   ;;  %s889_s20 = sphi %s948_s20, %s1194_s20   ;;  %s885_s19 = sphi %s946_s19, %s1193_s19   ;;  %s881_s18 = sphi %s944_s18, %s1192_s18  }
   0xa   : > { %1181 = sst [smem:[#allocation9_spill]] %s905_s24  ;;  %s30_s27 = sadd.s32 1, %s901_s23 }
   0xb   : > { %p31_p0 = scmp.ge.s32.totalorder %s30_s27, 3  ;;  %s33_s28 = sadd.s32 1, %s905_s24 }
   0xc   : > { %s66_s29 = sadd.s32 1, %s889_s20  ;;  %p73_p1 = scmp.ne.s32.totalorder %s889_s20, %s885_s19 }
   0xd   : > { %s1196_s27 = smov (%p31_p0, %s30_s27), 0  ;;  %s1198_s28 = smov (!%p31_p0, %s33_s28), %s905_s24 }
   0xe   : > { %1182 = sst [smem:[#allocation10_spill]] %s1196_s27  ;;  %p74_p2 = scmp.eq.s32.totalorder %s909_s25, 0 }
   0xf   : > { %p79_p3 = scmp.ne.s32.totalorder %s885_s19, %s881_s18  ;;  %p35_p4 = scmp.ge.s32.totalorder %s1198_s28, 2 }
  0x10   : > { %p80_p5 = scmp.eq.s32.totalorder %s676_s26, 0  ;;  %p993_p6 = por %p74_p2, %p73_p1 }
  0x11   : > { %s1200_s28 = smov (%p35_p4, %s1198_s28), 0  ;;  %p705_p8 = scmp.lt.s32.totalorder %s909_s25, 6 }
  0x12   : > { %1184 = sst [smem:[#allocation11_spill]] %s1200_s28  ;;  %p999_p7 = por %p80_p5, %p79_p3 }
  0x13   : > { %s63_s7 = ssub.s32 %s905_s24, %s1200_s28  ;;  %s1007_s8 = sand.u32 1, %s889_s20  }
  0x14   : > { %p64_p9 = scmp.eq.s32.totalorder %s63_s7, 0  ;;  %s680_s9 = sshll.u32 %s1007_s8, 8 }
  0x15   : > { %s681_s10 = sshll.u32 %s905_s24, 3  ;;  %s1186_s1 = sld [smem:[#allocation12_spill]] }
  0x16   : > { %s1012_s11 = scalar_select %p64_p9, %s889_s20, %s66_s29  }
  0x17   : > { %s221_s16 = scalar_lea.vmem [#allocation2], %s680_s9  ;;  %p1021_p10 = pnand %p705_p8, %p993_p6 }
  0x18   : > { %s228_s17 = sshll.u32 %s221_s16, 4  ;;  %p684_p11 = scmp.ge.s32.totalorder %s909_s25, 1  ;;  %s229_s17 = int_to_ptr.vmem [resolvable:$true] %s228_s17 }
  0x19   : > { %s218_s26 = scalar_lea.sflag [#allocation3], %s1007_s8  ;;  %s911_s29 = smov 256  }
  0x1a   : > { %s912_s7 = smov 128   ;;  %s913_s12 = smov 8  }
  0x1b   : > { %s225_s14 = scalar_lea.hbm %s1186_s1, %s681_s10  ;;  %p269_p12 = scmp.lt.s32.totalorder %s909_s25, 7 }
  0x1c   : > { %s226_s15 = sshll.u32 %s225_s14, 4  ;;  %s246_s30 = scalar_lea.hbm %s1172_s2, %s681_s10  ;;  %s227_s15 = int_to_ptr.hbm [resolvable:$true] %s226_s15 }
  0x1d   : > { %701 = dma.hbm_to_vmem [thread:$0]  (!%p1021_p10), %s227_s15, 4096, %s229_s17, %s218_s26, %s911_s29, %s912_s7, %s913_s12  }
  0x1e   : > { %p270_p13 = pnand %p684_p11, %p269_p12  ;;  %s247_s16 = sshll.u32 %s246_s30, 4  ;;  %s248_s16 = int_to_ptr.hbm [resolvable:$true] %s247_s16 }
  0x1f   : > { %s242_s1 = scalar_lea.vmem [#allocation4], %s680_s9  ;;  %s239_s27 = scalar_lea.sflag [#allocation5], %s1007_s8 }
  0x20   : > { %s249_s28 = sshll.u32 %s242_s1, 4  ;;  %273 = sbr.rel (%p270_p13) target bundleno = 237 (0xed), region = 40  ;;  %s250_s28 = int_to_ptr.vmem [resolvable:$true] %s249_s28 }
  0x21   : > { %704 = dma.hbm_to_vmem [thread:$0]  (!%p1021_p10), %s248_s16, 4096, %s250_s28, %s239_s27, %s911_s29, %s912_s7, %s913_s12  }
  0x22   : > { %s275_s24 = sand.u32 (!%p270_p13), 1, %s885_s19  }
  0x23   : > { %s685_s23 = sshll.u32 (!%p270_p13), %s275_s24, 8  ;;  %s276_s15 = scalar_lea.sflag (!%p270_p13), [#allocation3], %s275_s24 }
  0x24   : > { %s1037_s17 = scalar_lea.vmem (!%p270_p13), [#allocation2], %s685_s23 }
  0x25   : > { %872 = dma.done.wait (%p999_p7), %s276_s15, 4096  }
  0x26   : > { %874 = vsyncadd (%p999_p7), %s276_s15, 4294963200  ;;  %s286_s9 = scalar_lea.sflag [#allocation5], %s275_s24  ;;  %s1043_s1 = scalar_lea.vmem [#allocation4], %s685_s23 }
  0x27   : > { %876 = dma.done.wait (%p999_p7), %s286_s9, 4096  }
  0x28   : > { %878 = vsyncadd (%p999_p7), %s286_s9, 4294963200  ;;  %p336_p0 = scmp.lt.s32.totalorder %s893_s21, 2  ;;  %p341_p1 = scmp.lt.s32.totalorder %s897_s22, 1  ;;  %v372_v0 = vld [vmem:[%s1037_s17 + $0x78] sm:$0xff]  ;;  %v371_v1 = vld [vmem:[%s1037_s17 + $0x70] sm:$0xff] }
  0x29   : > { %v388_v2 = vld [vmem:[%s1037_s17 + $0xf8] sm:$0xff]  ;;  %425 = vmatpush.msra.mxu0 %v372_v0  ;;  %v387_v3 = vld [vmem:[%s1037_s17 + $0xf0] sm:$0xff]  ;;  %v370_v4 = vld [vmem:[%s1037_s17 + $0x68] sm:$0xff] }
  0x2a   : > { %s1202_s21 = smov (!%p336_p0, %s893_s21), 2  ;;  %s1204_s22 = smov (!%p341_p1, %s897_s22), 1  ;;  %445 = vmatpush.msra.mxu1 %v388_v2  ;;  %v386_v5 = vld [vmem:[%s1037_s17 + $0xe8] sm:$0xff]  ;;  %v369_v6 = vld [vmem:[%s1037_s17 + $0x60] sm:$0xff]  ;;  %v368_v8 = vld [vmem:[%s1037_s17 + $0x58] sm:$0xff] }
  0x2b   : > { %s689_s23 = sshll.u32 %s1202_s21, 1  ;;  %426 = vmatpush.msra.mxu0 %v371_v1  ;;  %v385_v7 = vld [vmem:[%s1037_s17 + $0xe0] sm:$0xff]  ;;  %v384_v9 = vld [vmem:[%s1037_s17 + $0xd8] sm:$0xff]  ;;  %v367_v10 = vld [vmem:[%s1037_s17 + $0x50] sm:$0xff]  ;;  %s343_s6 = scalar_lea.vmem %s1173_s3, %s1204_s22 }
  0x2c   : > { %s1059_s24 = sadd.s32 %s689_s23, %s1204_s22  ;;  %446 = vmatpush.msra.mxu1 %v387_v3  ;;  %v383_v11 = vld [vmem:[%s1037_s17 + $0xd0] sm:$0xff]  ;;  %v366_v12 = vld [vmem:[%s1037_s17 + $0x48] sm:$0xff]  ;;  %v404_v13 = vld [vmem:[%s1043_s1 + $0x78] sm:$0xff]  ;;  %s693_s8 = sshll.u32 %s1202_s21, 4 }
  0x2d   : > { %427 = vmatpush.msra.mxu0 %v370_v4  ;;  %v382_v14 = vld [vmem:[%s1037_s17 + $0xc8] sm:$0xff]  ;;  %469 = vmatpush.msra.mxu2 %v404_v13  ;;  %v403_v15 = vld [vmem:[%s1043_s1 + $0x70] sm:$0xff]  ;;  %v420_v16 = vld [vmem:[%s1043_s1 + $0xf8] sm:$0xff]  ;;  %s340_s21 = scalar_lea.vmem %s1170_s0, %s693_s8  ;;  %s346_s7 = scalar_lea.vmem %s1174_s4, %s1204_s22 }
  0x2e   : > { %447 = vmatpush.msra.mxu1 %v386_v5  ;;  %v402_v17 = vld [vmem:[%s1043_s1 + $0x68] sm:$0xff]  ;;  %v419_v18 = vld [vmem:[%s1043_s1 + $0xf0] sm:$0xff]  ;;  %v365_v19 = vld [vmem:[%s1037_s17 + $0x40] sm:$0xff]  ;;  %489 = vmatpush.msra.mxu3 %v420_v16  ;;  %s690_s22 = sshll.u32 %s1059_s24, 3 }
  0x2f   : > { %428 = vmatpush.msra.mxu0 %v369_v6  ;;  %v381_v20 = vld [vmem:[%s1037_s17 + $0xc0] sm:$0xff]  ;;  %470 = vmatpush.msra.mxu2 %v403_v15  ;;  %v418_v22 = vld [vmem:[%s1043_s1 + $0xe8] sm:$0xff]  ;;  %v364_v23 = vld [vmem:[%s1037_s17 + $0x38] sm:$0xff]  ;;  %s354_s16 = scalar_lea.vmem %s1175_s5, %s690_s22 }
  0x30   : > { %448 = vmatpush.msra.mxu1 %v385_v7  ;;  %v401_v21 = vld [vmem:[%s1043_s1 + $0x60] sm:$0xff]  ;;  %v380_v24 = vld [vmem:[%s1037_s17 + $0xb8] sm:$0xff]  ;;  %490 = vmatpush.msra.mxu3 %v419_v18  ;;  %v363_v27 = vld [vmem:[%s1037_s17 + $0x30] sm:$0xff] }
  0x31   : > { %429 = vmatpush.msra.mxu0 %v368_v8  ;;  %471 = vmatpush.msra.mxu2 %v402_v17  ;;  %v400_v25 = vld [vmem:[%s1043_s1 + $0x58] sm:$0xff]  ;;  %v417_v26 = vld [vmem:[%s1043_s1 + $0xe0] sm:$0xff]  ;;  %v379_v28 = vld [vmem:[%s1037_s17 + $0xb0] sm:$0xff] }
  0x32   : > { %449 = vmatpush.msra.mxu1 %v384_v9  ;;  %491 = vmatpush.msra.mxu3 %v418_v22  ;;  %v399_v29 = vld [vmem:[%s1043_s1 + $0x50] sm:$0xff]  ;;  %v416_v30 = vld [vmem:[%s1043_s1 + $0xd8] sm:$0xff]  ;;  %v362_v31 = vld [vmem:[%s1037_s17 + $0x28] sm:$0xff] }
  0x33   : > { %430 = vmatpush.msra.mxu0 %v367_v10  ;;  %472 = vmatpush.msra.mxu2 %v401_v21  ;;  %v378_v32 = vld [vmem:[%s1037_s17 + $0xa8] sm:$0xff]  ;;  %v415_v34 = vld [vmem:[%s1043_s1 + $0xd0] sm:$0xff]  ;;  %v361_v35 = vld [vmem:[%s1037_s17 + $0x20] sm:$0xff] }
  0x34   : > { %450 = vmatpush.msra.mxu1 %v383_v11  ;;  %492 = vmatpush.msra.mxu3 %v417_v26  ;;  %v398_v33 = vld [vmem:[%s1043_s1 + $0x48] sm:$0xff]  ;;  %v377_v36 = vld [vmem:[%s1037_s17 + $0xa0] sm:$0xff]  ;;  %v360_v39 = vld [vmem:[%s1037_s17 + $0x18] sm:$0xff] }
  0x35   : > { %431 = vmatpush.msra.mxu0 %v366_v12  ;;  %473 = vmatpush.msra.mxu2 %v400_v25  ;;  %v397_v37 = vld [vmem:[%s1043_s1 + $0x40] sm:$0xff]  ;;  %v414_v38 = vld [vmem:[%s1043_s1 + $0xc8] sm:$0xff]  ;;  %v376_v40 = vld [vmem:[%s1037_s17 + $0x98] sm:$0xff] }
  0x36   : > { %451 = vmatpush.msra.mxu1 %v382_v14  ;;  %493 = vmatpush.msra.mxu3 %v416_v30  ;;  %v396_v41 = vld [vmem:[%s1043_s1 + $0x38] sm:$0xff]  ;;  %v413_v42 = vld [vmem:[%s1043_s1 + $0xc0] sm:$0xff]  ;;  %v359_v43 = vld [vmem:[%s1037_s17 + $0x10] sm:$0xff] }
  0x37   : > { %432 = vmatpush.msra.mxu0 %v365_v19  ;;  %474 = vmatpush.msra.mxu2 %v399_v29  ;;  %v375_v44 = vld [vmem:[%s1037_s17 + $0x90] sm:$0xff]  ;;  %v412_v46 = vld [vmem:[%s1043_s1 + $0xb8] sm:$0xff]  ;;  %v358_v47 = vld [vmem:[%s1037_s17 + $0x8] sm:$0xff] }
  0x38   : > { %452 = vmatpush.msra.mxu1 %v381_v20  ;;  %494 = vmatpush.msra.mxu3 %v415_v34  ;;  %v395_v45 = vld [vmem:[%s1043_s1 + $0x30] sm:$0xff]  ;;  %v374_v48 = vld [vmem:[%s1037_s17 + $0x88] sm:$0xff]  ;;  %v357_v51 = vld [vmem:[%s1037_s17] sm:$0xff] }
  0x39   : > { %433 = vmatpush.msra.mxu0 %v364_v23  ;;  %475 = vmatpush.msra.mxu2 %v398_v33  ;;  %v394_v49 = vld [vmem:[%s1043_s1 + $0x28] sm:$0xff]  ;;  %v411_v50 = vld [vmem:[%s1043_s1 + $0xb0] sm:$0xff]  ;;  %v373_v52 = vld [vmem:[%s1037_s17 + $0x80] sm:$0xff] }
  0x3a   : > { %453 = vmatpush.msra.mxu1 %v380_v24  ;;  %495 = vmatpush.msra.mxu3 %v414_v38  ;;  %v355_v53 = vld [vmem:[%s340_s21] sm:$0xff]  ;;  %v356_v54 = vld [vmem:[%s340_s21 + $0x8] sm:$0xff]  ;;  %v392_v57 = vld [vmem:[%s1043_s1 + $0x18] sm:$0xff] }
  0x3b   : > { %434 = vmatpush.msra.mxu0 %v363_v27  ;;  %476 = vmatpush.msra.mxu2 %v397_v37  ;;  %v393_v55 = vld [vmem:[%s1043_s1 + $0x20] sm:$0xff]  ;;  %v410_v56 = vld [vmem:[%s1043_s1 + $0xa8] sm:$0xff]  ;;  %v391_v59 = vld [vmem:[%s1043_s1 + $0x10] sm:$0xff] }
  0x3c   : > { %454 = vmatpush.msra.mxu1 %v379_v28  ;;  %496 = vmatpush.msra.mxu3 %v413_v42  ;;  %v409_v58 = vld [vmem:[%s1043_s1 + $0xa0] sm:$0xff]  ;;  %v408_v60 = vld [vmem:[%s1043_s1 + $0x98] sm:$0xff]  ;;  %v390_v61 = vld [vmem:[%s1043_s1 + $0x8] sm:$0xff] }
  0x3d   : > { %435 = vmatpush.msra.mxu0 %v362_v31  ;;  %477 = vmatpush.msra.mxu2 %v396_v41  ;;  %v407_v62 = vld [vmem:[%s1043_s1 + $0x90] sm:$0xff]  ;;  %v389_v63 = vld [vmem:[%s1043_s1] sm:$0xff]  ;;  %v406_v0 = vld [vmem:[%s1043_s1 + $0x88] sm:$0xff] }
  0x3e   : > { %455 = vmatpush.msra.mxu1 %v378_v32  ;;  %497 = vmatpush.msra.mxu3 %v412_v46  ;;  %v405_v1 = vld [vmem:[%s1043_s1 + $0x80] sm:$0xff] }
  0x3f   : > { %436 = vmatpush.msra.mxu0 %v361_v35  ;;  %478 = vmatpush.msra.mxu2 %v395_v45  ;;  %v773_v2 = vld [vmem:[%s343_s6] ss:$0 sm:$0xff] }
  0x40   : > { %456 = vmatpush.msra.mxu1 %v377_v36  ;;  %498 = vmatpush.msra.mxu3 %v411_v50  ;;  %v774_v13 = vld [vmem:[%s346_s7] ss:$0 sm:$0xff] }
  0x41   : > { %437 = vmatpush.msra.mxu0 %v360_v39  ;;  %479 = vmatpush.msra.mxu2 %v394_v49 }
  0x42   : > { %457 = vmatpush.msra.mxu1 %v376_v40  ;;  %499 = vmatpush.msra.mxu3 %v410_v56 }
  0x43   : > { %438 = vmatpush.msra.mxu0 %v359_v43  ;;  %480 = vmatpush.msra.mxu2 %v393_v55 }
  0x44   : > { %458 = vmatpush.msra.mxu1 %v375_v44  ;;  %500 = vmatpush.msra.mxu3 %v409_v58 }
  0x45   : > { %439 = vmatpush.msra.mxu0 %v358_v47  ;;  %481 = vmatpush.msra.mxu2 %v392_v57 }
  0x46   : > { %459 = vmatpush.msra.mxu1 %v374_v48  ;;  %501 = vmatpush.msra.mxu3 %v408_v60 }
  0x47   : > { %440 = vmatpush.msra.mxu0 %v357_v51  ;;  %482 = vmatpush.msra.mxu2 %v391_v59 }
  0x48   : > { %460 = vmatpush.msra.mxu1 %v373_v52  ;;  %441 = vmatmul.f32.vlgmr.msra.gmra.mxu0 %v355_v53 }
  0x49   : > { %461 = vmatmul.f32.vlgmr.msra.gmra.mxu1 %v356_v54  ;;  %483 = vmatpush.msra.mxu2 %v390_v61 }
  0x4a   : > { %502 = vmatpush.msra.mxu3 %v407_v62 }
  0x4b   : > { %484 = vmatpush.msra.mxu2 %v389_v63 }
  0x4c   : > { %503 = vmatpush.msra.mxu3 %v406_v0  ;;  %485 = vmatmul.f32.vlgmr.msra.gmra.mxu2 %v355_v53 }
  0x4e   : > { %504 = vmatpush.msra.mxu3 %v405_v1 }
  0x4f   : > { %505 = vmatmul.f32.vlgmr.msra.gmra.mxu3 %v356_v54 }
  0xc5   : > { %v442_v3 = vpop.f32.mrf.mxu0 }
  0xc6   : > { %v462_v4 = vpop.f32.mrf.mxu1  ;;  %v443_v5 = vadd.f32 %v773_v2, %v442_v3 }
  0xc8   : > { %v463_v6 = vadd.f32 %v462_v4, %v443_v5 }
  0xca   : > { %v509_v7 = vsub.f32 0.0, %v463_v6 }
  0xcc   : > { %v510_v8 = vmul.f32 1.442695, %v509_v7 }
  0xce   : > { %775 = vpow2.f32 %v510_v8 }
  0xcf   : > { %v486_v14 = vpop.f32.mrf.mxu2 }
  0xd0   : > { %v487_v19 = vadd.f32 %v774_v13, %v486_v14 }
  0xd2   : > { %v506_v20 = vpop.f32.mrf.mxu3 }
  0xd3   : > { %v507_v24 = vadd.f32 %v506_v20, %v487_v19 }
  0xd4   : > { %v776_v9 = vpop.eup %775 }
  0xd5   : > { %v512_v10 = vadd.f32 1.0, %v776_v9 }
  0xd7   : > { %777 = vrcp.f32 %v512_v10  ;;  %v524_v16 = vand.u32 2147483648, %v512_v10  ;;  %v522_v18 = vand.u32 2147483647, %v512_v10  ;;  %vm518_vm1 = vweird.f32 %v512_v10 }
  0xd9   : > { %v525_v22 = vor.u32 1.1754944e-38, %v524_v16  ;;  %vm523_vm3 = vcmp.eq.f32.partialorder %v522_v18, 8.507059e+37 }
  0xdd   : > { %v778_v11 = vpop.eup %777 }
  0xde   : > { %v514_v12 = vmul.f32 %v778_v11, %v512_v10  ;;  %vm519_vm0 = vweird.f32 %v778_v11 }
  0xdf   : > { %vm520_vm2 = vmor %vm518_vm1, %vm519_vm0 }
  0xe0   : > { %v515_v15 = vsub.f32 1.0, %v514_v12 }
  0xe2   : > { %v516_v17 = vmul.f32 %v778_v11, %v515_v15 }
  0xe4   : > { %v517_v21 = vadd.f32 %v778_v11, %v516_v17 }
  0xe6   : > { %v521_v23 = vsel %vm520_vm2, %v778_v11, %v517_v21 }
  0xe7   : > { %v526_v25 = vsel %vm523_vm3, %v525_v22, %v521_v23 }
  0xe8   : > { %v528_v26 = vmul.f32 %v526_v25, %v463_v6 }
  0xea   : > { %v529_v27 = vmul.f32 %v528_v26, %v507_v24 }
  0xec   : > { %530 = vst [vmem:[%s354_s16] sm:$0xff] %v529_v27 }
  0xed PF: > { %s21_s25 = sadd.s32 1, %s909_s25   ;;  %s1188_s21 = sld [smem:[#allocation8_spill]] }
  0xee   : > { %p18_p2 = scmp.ge.s32.totalorder %s21_s25, 8   ;;  %s1189_s22 = sld [smem:[#allocation9_spill]] }
  0xef   : > { %s1190_s23 = sld [smem:[#allocation10_spill]]  ;;  %s1192_s18 = smov %s885_s19 }
  0xf0   : > { %s1191_s24 = sld [smem:[#allocation11_spill]]  ;;  %s1193_s19 = smov %s889_s20 }
  0xf1   : > { %s1194_s20 = smov %s1012_s11  ;;  %20 = sbr.rel (!%p18_p2) target bundleno = 9 (0x9), region = 102 }
  0xf6   :  { %558 = vsyncpa [#allocation3], 1 }
  0xf7   :  { %560 = vsyncpa [#allocation3 + $0x1], 1 }
  0xf8   :  { %561 = vsyncpa [#allocation5], 1 }
  0xf9   :  { %563 = vsyncpa [#allocation5 + $0x1], 1 }

</bundles_post_ra>
